<compile_context>
chip_gen: v7x
topology: tpu7x:2x2x1
jax: 0.10.0
libtpu: 0.0.40
codegen_flags: <defaults>
</compile_context>

<pallas_src>
import functools

import jax
import jax.numpy as jnp
from jax.experimental import pallas as pl
from jax.experimental.pallas import tpu as pltpu

# Deterministic "module parameters" (loss weights from __init__).
W_ACCEL = 0.3
W_VEL = 0.5
W_POS = 0.2

_MAX_TILE_BYTES = 4 * 1024 * 1024        # per-input, per-buffer VMEM tile cap
_VMEM_LIMIT_BYTES = 32 * 1024 * 1024     # 2 inputs x 2 buffers x tile + slack


def _smoothnet_loss_kernel(d_ref, g_ref, out_ref, *, t, c,
                           c_pos, c_vel, c_acc,
                           total_rows, block_rows, need_mask):
    """d_ref, g_ref: (Bt, T*C) VMEM tiles (batch rows in sublanes, time-major
    time*channel along lanes).  out_ref: (1, 8, 128) f32 block private to this
    grid step; the weighted partial sum is written at [0, 0, 0], rest zeros."""
    # Single diff; all three terms are linear in (denoise - gt).
    diff = d_ref[...].astype(jnp.float32) - g_ref[...].astype(jnp.float32)

    if need_mask:
        # Last tile may extend past B: zero out the padded (garbage) rows.
        i = pl.program_id(0)
        valid = total_rows - i * block_rows        # >= block_rows except last tile
        row_ids = jax.lax.broadcasted_iota(jnp.int32, diff.shape, 0)
        diff = jnp.where(row_ids < valid, diff, jnp.float32(0.0))

    # Position term.
    s_pos = jnp.sum(jnp.abs(diff))

    # Velocity term: x[:, :, :2] - x[:, :, 1:-1] applied to diff.  In the
    # (rows, t*C + c) lane layout, time slices are static lane-offset slices.
    head = diff[:, : 2 * c]                        # time steps {0, 1}
    mid = diff[:, c: (t - 1) * c]                  # time steps {1, .., T-2}
    if t == 3:                                     # reference broadcast quirk
        mid = jnp.concatenate([mid, mid], axis=1)
    s_vel = jnp.sum(jnp.abs(head - mid))

    # Acceleration term: second finite difference along time.
    accel = (diff[:, : (t - 2) * c]
             - 2.0 * diff[:, c: (t - 1) * c]
             + diff[:, 2 * c:])
    s_acc = jnp.sum(jnp.abs(accel))

    s = c_pos * s_pos + c_vel * s_vel + c_acc * s_acc

    # Dense (8, 128) output block; partial lives at [0,0,0], rest exact zeros
    # so the wrapper-side jnp.sum is unaffected.
    shp = out_ref.shape
    r = jax.lax.broadcasted_iota(jnp.int32, shp, 1)
    l = jax.lax.broadcasted_iota(jnp.int32, shp, 2)
    out_ref[...] = jnp.where((r == 0) & (l == 0), s, jnp.float32(0.0))


def smoothnet_loss(denoise, gt,
                   w_accel=W_ACCEL, w_vel=W_VEL, w_pos=W_POS,
                   *, block_rows=None):
    """Weighted SmoothNet loss.  denoise, gt: (B, T, C) float arrays."""
    B, T, C = denoise.shape
    assert gt.shape == denoise.shape
    # The reference velocity slicing only broadcasts for T in {3, 4}.
    assert T in (3, 4), "SmoothNetLoss velocity slicing needs T in {3, 4}"

    TC = T * C
    itemsize = jnp.dtype(denoise.dtype).itemsize
    sub = {4: 8, 2: 16, 1: 32}.get(itemsize, 8)    # sublane packing per dtype

    # Native-layout view: (B, T, C) -> (B, T*C) is a free reshape (trailing
    # contiguous dims merge); NO transpose / pad copies materialized in HBM.
    d2 = jnp.reshape(denoise, (B, TC))
    g2 = jnp.reshape(gt, (B, TC))

    # Tile the batch/sublane axis: big enough to amortize per-step overhead,
    # small enough that 2 inputs x 2 double-buffers fit scoped VMEM everywhere.
    if block_rows is None:
        cap = max(sub, (_MAX_TILE_BYTES // (TC * itemsize)) // sub * sub)
        block_rows = B if B <= cap else cap
    else:
        assert block_rows == B or (block_rows > 0 and block_rows % sub == 0)
    num_tiles = pl.cdiv(B, block_rows)
    need_mask = (B % block_rows) != 0

    # Fold loss weights and per-term mean divisors (true element counts).
    c_pos = float(w_pos) / float(B * T * C)
    c_vel = float(w_vel) / float(B * C * 2)
    c_acc = float(w_accel) / float(B * C * (T - 2))

    kernel = functools.partial(
        _smoothnet_loss_kernel, t=T, c=C,
        c_pos=c_pos, c_vel=c_vel, c_acc=c_acc,
        total_rows=B, block_rows=block_rows, need_mask=need_mask)

    partials = pl.pallas_call(
        kernel,
        out_shape=jax.ShapeDtypeStruct((num_tiles, 8, 128), jnp.float32),
        grid=(num_tiles,),
        in_specs=[
            pl.BlockSpec((block_rows, TC), lambda i: (i, 0)),
            pl.BlockSpec((block_rows, TC), lambda i: (i, 0)),
        ],
        out_specs=pl.BlockSpec((1, 8, 128), lambda i: (i, 0, 0)),
        compiler_params=pltpu.CompilerParams(
            # Independent per-tile partials -> shardable across TensorCores.
            dimension_semantics=("parallel",),
            vmem_limit_bytes=_VMEM_LIMIT_BYTES,
        ),
        cost_estimate=pl.CostEstimate(
            flops=12 * B * T * C,
            transcendentals=0,
            bytes_accessed=2 * B * TC * itemsize + num_tiles * 8 * 128 * 4,
        ),
    )(d2, g2)

    # Tiny final reduction over per-tile partials (mostly exact zeros).
    return jnp.sum(partials)


def smoothnet_loss_ref(denoise, gt, w_accel=W_ACCEL, w_vel=W_VEL, w_pos=W_POS):
    """Pure-JAX transcription of the PyTorch forward (for verification)."""
    d = jnp.transpose(denoise, (0, 2, 1)).astype(jnp.float32)
    g = jnp.transpose(gt, (0, 2, 1)).astype(jnp.float32)
    loss_pos = jnp.mean(jnp.abs(d - g))
    vel_g = g[:, :, :2] - g[:, :, 1:-1]
    vel_d = d[:, :, :2] - d[:, :, 1:-1]
    acc_g = g[:, :, :-2] - 2.0 * g[:, :, 1:-1] + g[:, :, 2:]
    acc_d = d[:, :, :-2] - 2.0 * d[:, :, 1:-1] + d[:, :, 2:]
    loss_vel = jnp.mean(jnp.abs(vel_d - vel_g))
    loss_acc = jnp.mean(jnp.abs(acc_d - acc_g))
    return w_accel * loss_acc + w_pos * loss_pos + w_vel * loss_vel


if __name__ == "__main__":
    key = jax.random.PRNGKey(0)
    ks = jax.random.split(key, 6)

    # Case 1: canonical module shapes — single tile, T*C = 128 lanes.
    B, T, C = 2, 4, 32
    d1 = jax.random.normal(ks[0], (B, T, C), dtype=jnp.float32)
    g1 = jax.random.normal(ks[1], (B, T, C), dtype=jnp.float32)
    out1 = jax.block_until_ready(jax.jit(smoothnet_loss)(d1, g1))
    ref1 = smoothnet_loss_ref(d1, g1)
    assert jnp.allclose(out1, ref1, rtol=1e-5, atol=1e-5), (out1, ref1)

    # Case 2: multi-tile grid with a partial (masked) last tile (B=50, Bt=16).
    B2, T2, C2 = 50, 4, 32
    d2 = jax.random.normal(ks[2], (B2, T2, C2), dtype=jnp.float32)
    g2 = jax.random.normal(ks[3], (B2, T2, C2), dtype=jnp.float32)
    f2 = jax.jit(functools.partial(smoothnet_loss, block_rows=16))
    out2 = jax.block_until_ready(f2(d2, g2))
    ref2 = smoothnet_loss_ref(d2, g2)
    assert jnp.allclose(out2, ref2, rtol=1e-5, atol=1e-5), (out2, ref2)

    # Case 3: T=3 exercises the reference's velocity broadcast quirk.
    B3, T3, C3 = 8, 3, 32
    d3 = jax.random.normal(ks[4], (B3, T3, C3), dtype=jnp.float32)
    g3 = jax.random.normal(ks[5], (B3, T3, C3), dtype=jnp.float32)
    out3 = jax.block_until_ready(jax.jit(smoothnet_loss)(d3, g3))
    ref3 = smoothnet_loss_ref(d3, g3)
    assert jnp.allclose(out3, ref3, rtol=1e-5, atol=1e-5), (out3, ref3)

    print("KERNEL_OK")
</pallas_src>

<mosaic_0001>
module attributes {stable_mosaic.version = 11 : i64} {
  func.func @_smoothnet_loss_kernel(%arg0: i32, %arg1: memref<2x128xf32, #tpu.memory_space<vmem>>, %arg2: memref<2x128xf32, #tpu.memory_space<vmem>>, %arg3: memref<1x8x128xf32, #tpu.memory_space<vmem>>) attributes {dimension_semantics = [#tpu.dimension_semantics<parallel>], iteration_bounds = array<i64: 1>, scalar_prefetch = 0 : i64, scratch_operands = 0 : i64, tpu.core_type = #tpu.core_type<tc>, window_params = [{transform_indices = @transform_0, window_bounds = array<i64: 2, 128>}, {transform_indices = @transform_1, window_bounds = array<i64: 2, 128>}, {transform_indices = @transform_2, window_bounds = array<i64: 1, 8, 128>}]} {
    %c0 = arith.constant 0 : index
    %c0_0 = arith.constant 0 : index
    %0 = vector.load %arg1[%c0, %c0_0] : memref<2x128xf32, #tpu.memory_space<vmem>>, vector<2x128xf32>
    %c0_1 = arith.constant 0 : index
    %c0_2 = arith.constant 0 : index
    %1 = vector.load %arg2[%c0_1, %c0_2] : memref<2x128xf32, #tpu.memory_space<vmem>>, vector<2x128xf32>
    %2 = arith.subf %0, %1 : vector<2x128xf32>
    %3 = math.absf %2 : vector<2x128xf32>
    %4 = vector.shape_cast %3 : vector<2x128xf32> to vector<1x2x128xf32>
    %cst = arith.constant dense<0.000000e+00> : vector<1xf32>
    %5 = vector.multi_reduction <add>, %4, %cst [1, 2] : vector<1x2x128xf32> to vector<1xf32>
    %6 = vector.shape_cast %5 : vector<1xf32> to vector<1x1x1xf32>
    %7 = vector.extract %6[0, 0, 0] : f32 from vector<1x1x1xf32>
    %8 = vector.extract_strided_slice %2 {offsets = [0, 0], sizes = [2, 64], strides = [1, 1]} : vector<2x128xf32> to vector<2x64xf32>
    %9 = vector.extract_strided_slice %2 {offsets = [0, 32], sizes = [2, 64], strides = [1, 1]} : vector<2x128xf32> to vector<2x64xf32>
    %10 = arith.subf %8, %9 : vector<2x64xf32>
    %11 = math.absf %10 : vector<2x64xf32>
    %12 = vector.shape_cast %11 : vector<2x64xf32> to vector<1x2x64xf32>
    %cst_3 = arith.constant dense<0.000000e+00> : vector<1xf32>
    %13 = vector.multi_reduction <add>, %12, %cst_3 [1, 2] : vector<1x2x64xf32> to vector<1xf32>
    %14 = vector.shape_cast %13 : vector<1xf32> to vector<1x1x1xf32>
    %15 = vector.extract %14[0, 0, 0] : f32 from vector<1x1x1xf32>
    %16 = vector.extract_strided_slice %2 {offsets = [0, 0], sizes = [2, 64], strides = [1, 1]} : vector<2x128xf32> to vector<2x64xf32>
    %17 = vector.extract_strided_slice %2 {offsets = [0, 32], sizes = [2, 64], strides = [1, 1]} : vector<2x128xf32> to vector<2x64xf32>
    %cst_4 = arith.constant 2.000000e+00 : f32
    %18 = vector.broadcast %cst_4 : f32 to vector<2x64xf32>
    %19 = arith.mulf %18, %17 : vector<2x64xf32>
    %20 = arith.subf %16, %19 : vector<2x64xf32>
    %21 = vector.extract_strided_slice %2 {offsets = [0, 64], sizes = [2, 64], strides = [1, 1]} : vector<2x128xf32> to vector<2x64xf32>
    %22 = arith.addf %20, %21 : vector<2x64xf32>
    %23 = math.absf %22 : vector<2x64xf32>
    %24 = vector.shape_cast %23 : vector<2x64xf32> to vector<1x2x64xf32>
    %cst_5 = arith.constant dense<0.000000e+00> : vector<1xf32>
    %25 = vector.multi_reduction <add>, %24, %cst_5 [1, 2] : vector<1x2x64xf32> to vector<1xf32>
    %26 = vector.shape_cast %25 : vector<1xf32> to vector<1x1x1xf32>
    %27 = vector.extract %26[0, 0, 0] : f32 from vector<1x1x1xf32>
    %cst_6 = arith.constant 7.812500e-04 : f32
    %28 = arith.mulf %cst_6, %7 : f32
    %cst_7 = arith.constant 3.906250e-03 : f32
    %29 = arith.mulf %cst_7, %15 : f32
    %30 = arith.addf %28, %29 : f32
    %cst_8 = arith.constant 2.343750e-03 : f32
    %31 = arith.mulf %cst_8, %27 : f32
    %32 = arith.addf %30, %31 : f32
    %33 = tpu.iota {dimensions = array<i32: 1>} : vector<1x8x128xi32>
    %34 = tpu.iota {dimensions = array<i32: 2>} : vector<1x8x128xi32>
    %c0_i32 = arith.constant 0 : i32
    %35 = vector.broadcast %c0_i32 : i32 to vector<1x8x128xi32>
    %36 = arith.cmpi eq, %33, %35 : vector<1x8x128xi32>
    %c0_i32_9 = arith.constant 0 : i32
    %37 = vector.broadcast %c0_i32_9 : i32 to vector<1x8x128xi32>
    %38 = arith.cmpi eq, %34, %37 : vector<1x8x128xi32>
    %39 = arith.andi %36, %38 : vector<1x8x128xi1>
    %cst_10 = arith.constant 0.000000e+00 : f32
    %40 = vector.broadcast %32 : f32 to vector<1x8x128xf32>
    %41 = vector.broadcast %cst_10 : f32 to vector<1x8x128xf32>
    %42 = arith.select %39, %40, %41 : vector<1x8x128xi1>, vector<1x8x128xf32>
    %c0_11 = arith.constant 0 : index
    %c0_12 = arith.constant 0 : index
    %c0_13 = arith.constant 0 : index
    %43 = vector.load %arg3[%c0_11, %c0_12, %c0_13] : memref<1x8x128xf32, #tpu.memory_space<vmem>>, vector<1x8x128xf32>
    tpu.vector_store %arg3[%c0_11, %c0_12, %c0_13], %42 {strides = array<i32>} : memref<1x8x128xf32, #tpu.memory_space<vmem>>, vector<1x8x128xf32>,
    return
  }
  func.func @transform_0(%arg0: i32) -> (i32, i32) {
    %c0_i32 = arith.constant 0 : i32
    %c0_i32_0 = arith.constant 0 : i32
    return %arg0, %c0_i32 : i32, i32
  }
  func.func @transform_1(%arg0: i32) -> (i32, i32) {
    %c0_i32 = arith.constant 0 : i32
    %c0_i32_0 = arith.constant 0 : i32
    return %arg0, %c0_i32 : i32, i32
  }
  func.func @transform_2(%arg0: i32) -> (i32, i32, i32) {
    %c0_i32 = arith.constant 0 : i32
    %c0_i32_0 = arith.constant 0 : i32
    %c0_i32_1 = arith.constant 0 : i32
    return %arg0, %c0_i32, %c0_i32_0 : i32, i32, i32
  }
}

</mosaic_0001>

<bundles_post_ra>
// kernel: smoothnet_loss.1
= control target key start
LH: loop header
LB: loop body
LE: loop exit
PB: predicated region body
PF: predicated region fallthrough
CT: control target
= control target key end

     0   :  { %s91_s13 = smov 96   ;;  %s92_s14 = smov 64   ;;  %vm15_vm0 = vcmask 1041408   ;;  %vm32_vm1 = vcmask 517120   ;;  %v69_v37 = vlaneseq  ;;  %s117_s0 = inlined_call_operand.vmem [shape: f32[2,128], index: 0, kind: input, shape index: {}]   ;;  %s118_s1 = inlined_call_operand.vmem [shape: f32[2,128], index: 1, kind: input, shape index: {}]   ;;  %s119_s2 = inlined_call_operand.vmem [shape: f32[1,8,128], index: 2, kind: output, shape index: {}]  }
   0x1   :  { %v11_v0 = vld [vmem:[%s117_s0] sm:$0x3] }
   0x2   :  { %v12_v1 = vld [vmem:[%s118_s1] sm:$0x3]  ;;  %v70_v38 = vshrl.u32 %v69_v37, 7  ;;  %v72_v39 = vand.u32 127, %v69_v37 }
   0x3   :  { %v13_v2 = vsub.f32 %v11_v0, %v12_v1 }
   0x4   :  { %vm73_vm2 = vcmp.eq.s32.totalorder %v70_v38, 0  ;;  %vm74_vm3 = vcmp.eq.s32.totalorder %v72_v39, 0 }
   0x5   :  { %27 = vrot.lane.b32.xlu0 %v13_v2, %s91_s13  ;;  %v43_v3 = vmul.f32 2.0, %v13_v2  ;;  %49 = vrot.lane.b32.xlu1 %v13_v2, %s92_s14  ;;  %v14_v4 = vand.u32 2147483647, %v13_v2  ;;  %vm75_vm4 = vmand %vm73_vm2, %vm74_vm3 }
   0x7   :  { %v16_v5 = vsel %vm15_vm0, %v14_v4, 0.0 }
   0x9   :  { %45 = vrot.lane.b32.xlu0 %v43_v3, %s91_s13 }
  0x29   :  { %17 = vadd.xlane.f32.xlu1 %v16_v5 }
  0x77   :  { %v28_v6 = vpop.permute.xlu0 %27  ;;  %v50_v10 = vpop.permute.xlu1 %49 }
  0x78   :  { %v30_v7 = vsub.f32 %v13_v2, %v28_v6 }
  0x7a   :  { %v31_v8 = vand.u32 2147483647, %v30_v7 }
  0x7b   :  { %v46_v9 = vpop.permute.xlu0 %45 }
  0x7c   :  { %v48_v11 = vsub.f32 %v13_v2, %v46_v9  ;;  %v33_v12 = vsel %vm32_vm1, %v31_v8, 0.0 }
  0x7d   :  { %34 = vadd.xlane.f32.xlu0 %v33_v12 }
  0x7e   :  { %v52_v13 = vadd.f32 %v50_v10, %v48_v11 }
  0x80   :  { %v53_v14 = vand.u32 2147483647, %v52_v13 }
  0x82   :  { %v54_v15 = vsel %vm32_vm1, %v53_v14, 0.0 }
  0x83   :  { %55 = vadd.xlane.f32.xlu0 %v54_v15 }
  0xb6   :  { %v18_v16 = vpop.xlane.xlu1 %17 }
  0xb7   :  { %v19_v17 = vrot.slane %v18_v16, 4 }
  0xb9   :  { %v20_v18 = vadd.f32 %v19_v17, %v18_v16 }
  0xbb   :  { %v21_v19 = vrot.slane %v20_v18, 2 }
  0xbd   :  { %v22_v20 = vadd.f32 %v21_v19, %v20_v18 }
  0xbf   :  { %v23_v21 = vrot.slane %v22_v20, 1 }
  0xc1   :  { %v24_v22 = vadd.f32 %v23_v21, %v22_v20 }
  0xc3   :  { %83 = vpush %v24_v22 }
  0xf4   :  { %s84_s0 = spop %83 }
  0xf5   :  { %s64_s16 = smul.f32 0.00078125, %s84_s0 }
 0x10a   :  { %v35_v23 = vpop.xlane.xlu0 %34 }
 0x10b   :  { %v36_v24 = vrot.slane %v35_v23, 4 }
 0x10d   :  { %v37_v25 = vadd.f32 %v36_v24, %v35_v23 }
 0x10f   :  { %v38_v26 = vrot.slane %v37_v25, 2 }
 0x110   :  { %v56_v27 = vpop.xlane.xlu0 %55 }
 0x111   :  { %v57_v28 = vrot.slane %v56_v27, 4  ;;  %v39_v29 = vadd.f32 %v38_v26, %v37_v25 }
 0x113   :  { %v58_v30 = vadd.f32 %v57_v28, %v56_v27  ;;  %v40_v31 = vrot.slane %v39_v29, 1 }
 0x115   :  { %v59_v32 = vrot.slane %v58_v30, 2  ;;  %v41_v33 = vadd.f32 %v40_v31, %v39_v29 }
 0x117   :  { %v60_v34 = vadd.f32 %v59_v32, %v58_v30  ;;  %85 = vpush %v41_v33 }
 0x119   :  { %v61_v35 = vrot.slane %v60_v34, 1 }
 0x11b   :  { %v62_v36 = vadd.f32 %v61_v35, %v60_v34 }
 0x11d   :  { %87 = vpush %v62_v36 }
 0x148   :  { %s86_s1 = spop %85 }
 0x149   :  { %s65_s15 = smul.f32 0.00390625, %s86_s1 }
 0x14b   :  { %s66_s18 = sadd.f32 %s65_s15, %s64_s16 }
 0x14e   :  { %s88_s17 = spop %87 }
 0x14f   :  { %s67_s19 = smul.f32 0.00234375, %s88_s17 }
 0x151   :  { %s68_s20 = sadd.f32 %s67_s19, %s66_s18 }
 0x153   :  { %v76_v40 = vstv %s68_s20 }
 0x154   :  { %v77_v41 = vsel %vm75_vm4, %v76_v40, 0.0 }
 0x155   :  { %78 = vst [vmem:[%s119_s2] sm:$0xff] %v77_v41 }

</bundles_post_ra>
